<compile_context>
chip_gen: v5e
topology: v5e:2x2
jax: 0.10.0
libtpu: 0.0.40
codegen_flags: <defaults>
</compile_context>

<pallas_src>
import math

import jax
import jax.numpy as jnp
from jax.experimental import pallas as pl
from jax.experimental.pallas import tpu as pltpu


_TARGET_BLOCK_BYTES = 2 << 20   # ~2 MiB main (x) block; ~10 MiB resident double-buffered


def _round_up(v, m):
    return -(-v // m) * m


def _round_down(v, m):
    return (v // m) * m


def _padded_block_bytes(shape, itemsize):
    """VMEM footprint of one block, padded to the (8, 128) tile grid."""
    dims = list(shape)
    dims[-1] = _round_up(dims[-1], 128)
    if len(dims) >= 2:
        dims[-2] = _round_up(dims[-2], 8)
    n = 1
    for d in dims:
        n *= d
    return n * itemsize


def _vmem_limit_bytes(block_byte_list):
    # Every in/out block is double-buffered; 2x headroom for compiler scratch,
    # floor 32 MiB (above all scoped defaults), cap 48 MiB (< v7x 64 MiB phys).
    need = 2 * sum(block_byte_list)
    return int(min(max(2 * need, 32 << 20), 48 << 20))


# ---------------------------------------------------------------------------
# Kernels
# ---------------------------------------------------------------------------

def _add_pe_kernel(x_ref, pe_ref, o_ref):
    # Generic broadcast add: works for both the lane-flattened (B, TL)+(1, TL)
    # layout and the row-dense (B, TS, D)+(TS, D) layout. The astype handles
    # bf16 x with an f32 pe table (compute promotes to f32, one rounding at the
    # store).
    o_ref[...] = (x_ref[...] + pe_ref[...]).astype(o_ref.dtype)


def _rope_kernel(x_ref, cos_ref, sin_ref, p_ref, q_ref, o_ref):
    # x_ref / o_ref: (1, TR, W); cos/sin: (TR, W); p/q: (W, W).
    # The even/odd de-interleave is folded into the kernel as two matmuls with
    # constant permutation matrices (x @ P = [x_even | x_odd],
    # x @ Q = [-x_odd | x_even]); the MXU is idle on this HBM-bound op.
    # TODO(synk): for very large D at f32, replace the (W,W) permutation
    # matmuls with a strided in-kernel de-interleave to avoid the multi-pass
    # f32 MXU cost and the W*W constant tables.
    x = x_ref[0]
    if x.dtype == jnp.float32:
        # HIGHEST keeps the 0/+-1 permutation matmul exact for f32 inputs.
        prec = jax.lax.Precision.HIGHEST
        p = p_ref[...]
        q = q_ref[...]
    else:
        # bf16 x times an exactly-representable 0/+-1 matrix: one MXU pass,
        # exact, accumulated in f32.
        prec = jax.lax.Precision.DEFAULT
        p = p_ref[...].astype(x.dtype)
        q = q_ref[...].astype(x.dtype)
    u = jnp.dot(x, p, preferred_element_type=jnp.float32, precision=prec)
    v = jnp.dot(x, q, preferred_element_type=jnp.float32, precision=prec)
    o_ref[0] = (u * cos_ref[...] + v * sin_ref[...]).astype(o_ref.dtype)


# ---------------------------------------------------------------------------
# Tile-size heuristics
# ---------------------------------------------------------------------------

def _pick_lane_tile(total_lanes, batch, itemsize, target=_TARGET_BLOCK_BYTES):
    """Lane-tile for the flattened add layout (B, S*D)."""
    if total_lanes <= 128:
        return total_lanes                       # single (possibly masked) block
    padded_rows = _round_up(batch, 8)            # account for sublane padding (B < 8)
    tl = max(128, _round_down(target // (padded_rows * itemsize), 128))
    # Keep >= 2 grid steps so both v7x TensorCores get work.
    tl = min(tl, _round_up(pl.cdiv(total_lanes, 2), 128))
    return tl


def _pick_row_tile(total_rows, row_bytes, *, want_split,
                   target=_TARGET_BLOCK_BYTES):
    """Row-tile (second-minor dim) for the row-dense add / rope layouts."""
    if total_rows <= 8:
        return total_rows                        # full-dim escape hatch
    tr = max(8, _round_down(target // max(row_bytes, 1), 8))
    if want_split:                               # >= 2 grid steps for megacore
        tr = min(tr, max(8, _round_up(pl.cdiv(total_rows, 2), 8)))
    return min(tr, _round_down(total_rows, 8))


# ---------------------------------------------------------------------------
# Pallas wrappers
# ---------------------------------------------------------------------------

def _add_pe_flat(x, pe_table, *, tile_lanes=None):
    """Lane-flattened layout: x viewed as (B, S*D), blocks (B, TL)."""
    B, S, D = x.shape
    L = S * D
    itemsize = jnp.dtype(x.dtype).itemsize
    pe_itemsize = jnp.dtype(pe_table.dtype).itemsize
    xf = x.reshape(B, L)
    TL = tile_lanes if tile_lanes is not None else _pick_lane_tile(L, B, itemsize)
    if TL % 128 == 0:
        # Pass the table whole (free reshape, no wrapper slice copy).
        pef = pe_table.reshape(1, pe_table.shape[0] * pe_table.shape[1])
    else:
        # Lane-unaligned tile => pe block must be the full extent: slice to L.
        pef = pe_table[:S].reshape(1, L)
    grid = (pl.cdiv(L, TL),)
    vmem = _vmem_limit_bytes([
        _padded_block_bytes((B, TL), itemsize),
        _padded_block_bytes((1, TL), pe_itemsize),
        _padded_block_bytes((B, TL), itemsize),
    ])
    out = pl.pallas_call(
        _add_pe_kernel,
        out_shape=jax.ShapeDtypeStruct((B, L), x.dtype),
        grid_spec=pltpu.PrefetchScalarGridSpec(
            num_scalar_prefetch=0,
            grid=grid,
            in_specs=[
                pl.BlockSpec((B, TL), lambda n: (0, n)),
                pl.BlockSpec((1, TL), lambda n: (0, n)),
            ],
            out_specs=pl.BlockSpec((B, TL), lambda n: (0, n)),
        ),
        compiler_params=pltpu.CompilerParams(
            dimension_semantics=("parallel",),
            vmem_limit_bytes=vmem),
    )(xf, pef)
    return out.reshape(B, S, D)


def _add_pe_rows(x, pe_table, *, tile_rows=None):
    """Row-dense layout for small batch: blocks (B, TS, D), pe block (TS, D).

    Requires D % 128 == 0 (lane-dense) and S % 8 == 0 (sublane-aligned tiles).
    Avoids the 8/B sublane padding of the flattened layout when B < 8.
    """
    B, S, D = x.shape
    itemsize = jnp.dtype(x.dtype).itemsize
    pe_itemsize = jnp.dtype(pe_table.dtype).itemsize
    row_bytes = B * D * itemsize
    TS = tile_rows if tile_rows is not None else _pick_row_tile(
        S, row_bytes, want_split=True)
    grid = (pl.cdiv(S, TS),)
    vmem = _vmem_limit_bytes([
        _padded_block_bytes((B, TS, D), itemsize),
        _padded_block_bytes((TS, D), pe_itemsize),
        _padded_block_bytes((B, TS, D), itemsize),
    ])
    return pl.pallas_call(
        _add_pe_kernel,
        out_shape=jax.ShapeDtypeStruct((B, S, D), x.dtype),
        grid_spec=pltpu.PrefetchScalarGridSpec(
            num_scalar_prefetch=0,
            grid=grid,
            in_specs=[
                pl.BlockSpec((B, TS, D), lambda s: (0, s, 0)),
                pl.BlockSpec((TS, D), lambda s: (s, 0)),
            ],
            out_specs=pl.BlockSpec((B, TS, D), lambda s: (0, s, 0)),
        ),
        compiler_params=pltpu.CompilerParams(
            dimension_semantics=("parallel",),
            vmem_limit_bytes=vmem),
    )(x, pe_table)


def _add_pe_pallas(x, pe_table, *, tile_lanes=None, tile_rows=None):
    B, S, D = x.shape
    if B < 8 and D % 128 == 0 and S % 8 == 0 and tile_lanes is None:
        return _add_pe_rows(x, pe_table, tile_rows=tile_rows)
    return _add_pe_flat(x, pe_table, tile_lanes=tile_lanes)


def _rope_pallas(x, cos_full, sin_full, p_mat, q_mat, *, group=1,
                 tile_rows=None):
    """x: (B, S, D) -> RoPE output (B, S, D).

    cos_full / sin_full: (S//group, group*D) tables ([cos|cos], [sin|sin] per
    position, grouped). p_mat / q_mat: (group*D, group*D) block-diagonal
    de-interleave / rotate matrices. The de-interleave of x happens in-kernel;
    x is read from HBM exactly once and the result written exactly once.
    """
    B, S, D = x.shape
    G = group
    W = G * D
    Rb = S // G
    xg = x.reshape(B, Rb, W)                     # free reshape (contiguous)
    itemsize = jnp.dtype(x.dtype).itemsize
    row_bytes = _round_up(W, 128) * itemsize
    TR = tile_rows if tile_rows is not None else _pick_row_tile(
        Rb, row_bytes, want_split=(B == 1))
    # Batch is the innermost grid axis: cos/sin/P/Q block indices only change
    # with the row-tile, so they are not re-fetched across the batch sweep.
    grid = (pl.cdiv(Rb, TR), B)
    vmem = _vmem_limit_bytes([
        _padded_block_bytes((1, TR, W), itemsize),
        _padded_block_bytes((TR, W), 4),
        _padded_block_bytes((TR, W), 4),
        _padded_block_bytes((W, W), 4),
        _padded_block_bytes((W, W), 4),
        _padded_block_bytes((1, TR, W), itemsize),
    ])
    out = pl.pallas_call(
        _rope_kernel,
        out_shape=jax.ShapeDtypeStruct((B, Rb, W), x.dtype),
        grid_spec=pltpu.PrefetchScalarGridSpec(
            num_scalar_prefetch=0,
            grid=grid,
            in_specs=[
                pl.BlockSpec((1, TR, W), lambda t, b: (b, t, 0)),
                pl.BlockSpec((TR, W), lambda t, b: (t, 0)),
                pl.BlockSpec((TR, W), lambda t, b: (t, 0)),
                pl.BlockSpec((W, W), lambda t, b: (0, 0)),
                pl.BlockSpec((W, W), lambda t, b: (0, 0)),
            ],
            out_specs=pl.BlockSpec((1, TR, W), lambda t, b: (b, t, 0)),
        ),
        compiler_params=pltpu.CompilerParams(
            dimension_semantics=("parallel", "parallel"),
            vmem_limit_bytes=vmem),
    )(xg, cos_full, sin_full, p_mat, q_mat)
    return out.reshape(B, S, D)


# ---------------------------------------------------------------------------
# Module-equivalent wrapper (parameter/buffer setup = plain JAX glue)
# ---------------------------------------------------------------------------

class PositionalEncoding:
    def __init__(self, dim_model, max_len=5000, encoding_type='sinusoidal',
                 key=None):
        self.encoding_type = encoding_type.lower()
        self.dim_model = dim_model
        self.max_len = max_len
        self.pe = None
        self._rope_cache = {}

        if self.encoding_type == 'sinusoidal':
            position = jnp.arange(max_len, dtype=jnp.float32)[:, None]
            div_term = jnp.exp(
                jnp.arange(0, dim_model, 2, dtype=jnp.float32)
                * (-math.log(10000.0) / dim_model))
            pe = jnp.zeros((max_len, dim_model), dtype=jnp.float32)
            pe = pe.at[:, 0::2].set(jnp.sin(position * div_term))
            pe = pe.at[:, 1::2].set(jnp.cos(position * div_term))
            self.pe = pe
        elif self.encoding_type == 'learned':
            # nn.Embedding default init: N(0, 1); deterministic synthetic init.
            if key is None:
                key = jax.random.PRNGKey(0)
            self.pe = jax.random.normal(
                key, (max_len, dim_model), dtype=jnp.float32)
        elif self.encoding_type == 'rope':
            assert dim_model % 2 == 0, 'RoPE requires even model dimension'
            half = dim_model // 2
            position = jnp.arange(max_len, dtype=jnp.float32)[:, None]
            dim_range = jnp.arange(half, dtype=jnp.float32)[None, :]
            inv_freq = 1.0 / (10000.0 ** (dim_range / half))
            angle = position * inv_freq                     # (max_len, half)
            cos = jnp.cos(angle)
            sin = jnp.sin(angle)
            # Full-width tables in the blocked output layout: [c|c], [s|s].
            # TODO(synk): optionally store these as bf16 to halve their HBM
            # traffic for small-batch workloads.
            self._cos_full = jnp.concatenate([cos, cos], axis=-1)
            self._sin_full = jnp.concatenate([sin, sin], axis=-1)
            # Constant de-interleave / rotate matrices:
            #   x @ P = [x_even | x_odd],   x @ Q = [-x_odd | x_even]
            i = jnp.arange(half)
            P = jnp.zeros((dim_model, dim_model), jnp.float32)
            P = P.at[2 * i, i].set(1.0).at[2 * i + 1, half + i].set(1.0)
            Q = jnp.zeros((dim_model, dim_model), jnp.float32)
            Q = Q.at[2 * i + 1, i].set(-1.0).at[2 * i, half + i].set(1.0)
            self._P = P
            self._Q = Q
        elif self.encoding_type == 'none':
            pass
        else:
            raise ValueError(f'Unsupported encoding_type: {self.encoding_type}')

    def _rope_constants(self, S, D):
        # Group G consecutive positions per lane-row when D < 128 so the output
        # stays lane-dense (G*D a multiple of 128 when the shapes allow it).
        G = 1
        if D < 128 and 128 % D == 0 and S % (128 // D) == 0:
            G = 128 // D
        key = (S, G)
        if key not in self._rope_cache:
            W = G * D
            Rb = S // G
            cosF = self._cos_full[:S].reshape(Rb, W)
            sinF = self._sin_full[:S].reshape(Rb, W)
            if G == 1:
                P, Q = self._P, self._Q
            else:
                eye = jnp.eye(G, dtype=jnp.float32)
                P = jnp.kron(eye, self._P)
                Q = jnp.kron(eye, self._Q)
            self._rope_cache[key] = (G, cosF, sinF, P, Q)
        return self._rope_cache[key]

    def __call__(self, x):
        B, S, D = x.shape
        if self.encoding_type in ('sinusoidal', 'learned'):
            # 'learned': positions = arange(S)  ->  pe(positions) == pe[:S]
            return _add_pe_pallas(x, self.pe)
        elif self.encoding_type == 'rope':
            G, cosF, sinF, P, Q = self._rope_constants(S, D)
            return _rope_pallas(x, cosF, sinF, P, Q, group=G)
        return x  # 'none'


# ---------------------------------------------------------------------------
# Pure-JAX references for verification
# ---------------------------------------------------------------------------

def _ref_forward(mod: PositionalEncoding, x):
    S = x.shape[1]
    if mod.encoding_type in ('sinusoidal', 'learned'):
        return x + mod.pe[:S]
    if mod.encoding_type == 'rope':
        D = x.shape[-1]
        half = D // 2
        position = jnp.arange(S, dtype=jnp.float32)[:, None]
        dim_range = jnp.arange(half, dtype=jnp.float32)[None, :]
        inv_freq = 1.0 / (10000.0 ** (dim_range / half))
        angle = position * inv_freq
        cos = jnp.cos(angle)[None]
        sin = jnp.sin(angle)[None]
        x1 = x[..., 0::2]
        x2 = x[..., 1::2]
        return jnp.concatenate([x1 * cos - x2 * sin, x1 * sin + x2 * cos],
                               axis=-1)
    return x


if __name__ == "__main__":
    key = jax.random.PRNGKey(0)
    kx, kemb, kx2, kx3 = jax.random.split(key, 4)

    failures = []

    def check(name, out, ref, atol=2e-5, rtol=2e-5):
        out = jax.block_until_ready(out)
        same_shape = (out.shape == ref.shape)
        close = bool(jnp.allclose(out.astype(jnp.float32),
                                  ref.astype(jnp.float32),
                                  atol=atol, rtol=rtol))
        if not (same_shape and close):
            failures.append(name)
            print(f"MISMATCH: {name}")

    # 1) Small base config (D=32 < 128): flattened add path, grouped RoPE path.
    B, S, D = 2, 8, 32
    x = jax.random.normal(kx, (B, S, D), dtype=jnp.float32)
    for enc in ('sinusoidal', 'learned', 'rope', 'none'):
        mod = PositionalEncoding(D, max_len=64, encoding_type=enc, key=kemb)
        check(f"{enc} f32 D=32", mod(x), _ref_forward(mod, x))

    # 2) D=256 config: row-dense add path + ungrouped RoPE, multi-step grids.
    B2, S2, D2 = 2, 16, 256
    x2 = jax.random.normal(kx2, (B2, S2, D2), dtype=jnp.float32)
    mod_sin = PositionalEncoding(D2, max_len=64, encoding_type='sinusoidal')
    check("sinusoidal f32 D=256 (row-dense)", mod_sin(x2),
          _ref_forward(mod_sin, x2))
    # Also exercise the lane-flattened add path with a multi-tile grid.
    check("sinusoidal f32 D=256 (flat, tiled)",
          _add_pe_flat(x2, mod_sin.pe, tile_lanes=1024),
          _ref_forward(mod_sin, x2))
    mod_rope = PositionalEncoding(D2, max_len=64, encoding_type='rope')
    check("rope f32 D=256", mod_rope(x2), _ref_forward(mod_rope, x2))
    # Multi row-tile RoPE grid.
    Gc, cosF, sinF, Pm, Qm = mod_rope._rope_constants(S2, D2)
    check("rope f32 D=256 (tiled rows)",
          _rope_pallas(x2, cosF, sinF, Pm, Qm, group=Gc, tile_rows=8),
          _ref_forward(mod_rope, x2))

    # 3) bf16 inputs (tables stay f32; kernels compute in f32, store bf16).
    xb = jax.random.normal(kx3, (B2, S2, D2),
                           dtype=jnp.float32).astype(jnp.bfloat16)
    check("sinusoidal bf16", mod_sin(xb),
          _ref_forward(mod_sin, xb.astype(jnp.float32)),
          atol=2e-2, rtol=2e-2)
    check("rope bf16", mod_rope(xb),
          _ref_forward(mod_rope, xb.astype(jnp.float32)),
          atol=2e-2, rtol=2e-2)

    if not failures:
        print("KERNEL_OK")
</pallas_src>

<mosaic_0001>
module attributes {stable_mosaic.version = 11 : i64} {
  func.func @_add_pe_kernel(%arg0: i32, %arg1: memref<2x128xf32, #tpu.memory_space<vmem>>, %arg2: memref<1x128xf32, #tpu.memory_space<vmem>>, %arg3: memref<2x128xf32, #tpu.memory_space<vmem>>) attributes {dimension_semantics = [#tpu.dimension_semantics<parallel>], iteration_bounds = array<i64: 2>, scalar_prefetch = 0 : i64, scratch_operands = 0 : i64, tpu.core_type = #tpu.core_type<tc>, window_params = [{transform_indices = @transform_0, window_bounds = array<i64: 2, 128>}, {transform_indices = @transform_1, window_bounds = array<i64: 1, 128>}, {transform_indices = @transform_2, window_bounds = array<i64: 2, 128>}]} {
    %c0 = arith.constant 0 : index
    %c0_0 = arith.constant 0 : index
    %0 = vector.load %arg1[%c0, %c0_0] : memref<2x128xf32, #tpu.memory_space<vmem>>, vector<2x128xf32>
    %c0_1 = arith.constant 0 : index
    %c0_2 = arith.constant 0 : index
    %1 = vector.load %arg2[%c0_1, %c0_2] : memref<1x128xf32, #tpu.memory_space<vmem>>, vector<1x128xf32>
    %2 = vector.broadcast %1 : vector<1x128xf32> to vector<2x128xf32>
    %3 = arith.addf %0, %2 : vector<2x128xf32>
    %c0_3 = arith.constant 0 : index
    %c0_4 = arith.constant 0 : index
    %4 = vector.load %arg3[%c0_3, %c0_4] : memref<2x128xf32, #tpu.memory_space<vmem>>, vector<2x128xf32>
    tpu.vector_store %arg3[%c0_3, %c0_4], %3 {strides = array<i32>} : memref<2x128xf32, #tpu.memory_space<vmem>>, vector<2x128xf32>,
    return
  }
  func.func @transform_0(%arg0: i32) -> (i32, i32) {
    %c0_i32 = arith.constant 0 : i32
    %c0_i32_0 = arith.constant 0 : i32
    return %c0_i32, %arg0 : i32, i32
  }
  func.func @transform_1(%arg0: i32) -> (i32, i32) {
    %c0_i32 = arith.constant 0 : i32
    %c0_i32_0 = arith.constant 0 : i32
    return %c0_i32, %arg0 : i32, i32
  }
  func.func @transform_2(%arg0: i32) -> (i32, i32) {
    %c0_i32 = arith.constant 0 : i32
    %c0_i32_0 = arith.constant 0 : i32
    return %c0_i32, %arg0 : i32, i32
  }
}

</mosaic_0001>

<bundles_post_ra>
// kernel: tpu_custom_call.1
= control target key start
LH: loop header
LB: loop body
LE: loop exit
PB: predicated region body
PF: predicated region fallthrough
CT: control target
= control target key end

     0   :  { %7 = vsyncpa [#allocation3], 0  ;;  %s682_s0 = inlined_call_operand.hbm [shape: f32[2,256], index: 0, kind: input, shape index: {}]   ;;  %s683_s1 = inlined_call_operand.hbm [shape: f32[1,2048], index: 1, kind: input, shape index: {}]   ;;  %s684_s2 = inlined_call_operand.hbm [shape: f32[2,256], index: 2, kind: output, shape index: {}]  }
   0x1   :  { %9 = vsyncpa [#allocation3 + $0x1], 0 }
   0x2   :  { %10 = vsyncpa [#allocation6], 0 }
   0x3   :  { %12 = vsyncpa [#allocation6 + $0x1], 0 }
   0x4   :  { %13 = vsyncpa [#allocation4], 0 }
   0x5   :  { %15 = vsyncpa [#allocation4 + $0x1], 0  ;;  %s519_s9 = smov 0   ;;  %s521_s10 = smov 0  }
   0x6   :  { %s523_s11 = smov 0   ;;  %s525_s12 = smov 0  }
   0x7 LB: > { %s540_s13 = sadd.s32 4294967295, %s502_s12   ;;  %s308_s14 = sadd.s32 4294967294, %s502_s12   ;;  %s502_s12 = sphi %s525_s12, %s695_s12   ;;  %s498_s11 = sphi %s523_s11, %s694_s11   ;;  %s494_s10 = sphi %s521_s10, %s693_s10   ;;  %s490_s9 = sphi %s519_s9, %s692_s9  }
   0x8   : > { %s544_s15 = sadd.s32 1, %s502_s12   ;;  %s28_s16 = sadd.s32 1, %s498_s11 }
   0x9   : > { %s25_s17 = ssub.s32 %s502_s12, %s544_s15  ;;  %p35_p0 = scmp.ne.s32.totalorder %s498_s11, %s494_s10 }
   0xa   : > { %p26_p1 = scmp.eq.s32.totalorder %s25_s17, 0  ;;  %p36_p2 = scmp.eq.s32.totalorder %s502_s12, 0 }
   0xb   : > { %p41_p3 = scmp.ne.s32.totalorder %s494_s10, %s490_s9  ;;  %p42_p4 = scmp.eq.s32.totalorder %s540_s13, 0 }
   0xc   : > { %s556_s18 = scalar_select %p26_p1, %s498_s11, %s28_s16  }
   0xd   : > { %p558_p5 = por %p36_p2, %p35_p0  ;;  %p562_p6 = por %p42_p4, %p41_p3 }
   0xe   : > { %p91_p7 = scmp.eq.s32.totalorder %s540_s13, 1  ;;  %p97_p8 = scmp.eq.s32.totalorder %s308_s14, 1 }
   0xf   : > { %p337_p10 = scmp.lt.s32.totalorder %s502_s12, 2  ;;  %s578_s23 = sand.u32 1, %s498_s11  }
  0x10   : > { %p569_p11 = por %p91_p7, %p35_p0  ;;  %p573_p12 = por %p97_p8, %p41_p3 }
  0x11   : > { %s312_s24 = sshll.u32 %s502_s12, 1  ;;  %s311_s25 = sshll.u32 %s578_s23, 1 }
  0x12   : > { %s125_s28 = scalar_lea.hbm %s682_s0, %s312_s24  ;;  %s121_s30 = scalar_lea.vmem [#allocation2], %s311_s25 }
  0x13   : > { %s127_s29 = sshll.u32 %s125_s28, 4  ;;  %s129_s3 = sshll.u32 %s121_s30, 4  ;;  %s128_s29 = int_to_ptr.hbm [resolvable:$true] %s127_s29  ;;  %s130_s3 = int_to_ptr.vmem [resolvable:$true] %s129_s3 }
  0x14   : > { %p587_p13 = pnand %p337_p10, %p558_p5  ;;  %p313_p0 = scmp.ge.s32.totalorder %s502_s12, 1 }
  0x15   : > { %p151_p1 = scmp.lt.s32.totalorder %s502_s12, 3  ;;  %s118_s5 = scalar_lea.sflag [#allocation3], %s578_s23 }
  0x16   : > { %s372_s6 = sshra.s32 %s128_s29, 4  ;;  %p376_p3 = pneg %p587_p13  ;;  %s373_s6 = int_to_ptr.hbm [resolvable:$true] %s372_s6 }
  0x17   : > { %s374_s7 = scalar_lea.hbm %s373_s6, 2  ;;  %s379_s16 = scalar_lea.hbm %s682_s0, 4 }
  0x18   : > { %p375_p2 = scmp.ne.s32.totalorder %s373_s6, %s374_s7  ;;  %p380_p5 = scmp.lt.s32.totalorder %s373_s6, %s682_s0 }
  0x19   : > { %p381_p8 = scmp.lt.s32.totalorder %s379_s16, %s374_s7 }
  0x1a   : > { %p377_p4 = pnand %p376_p3, %p375_p2 }
  0x1b   : > { %p382_p10 = por %p381_p8, %p380_p5 }
  0x1c   : > { %p378_p7 = pneg %p377_p4 }
  0x1e   : > { %p383_p9 = pnand %p382_p10, %p378_p7 }
  0x20   : > { %386 = shalt.err (!%p383_p9)
}
  0x21   : > { %329 = dma.hbm_to_vmem [thread:$0]  (!%p587_p13), %s128_s29, 32, %s130_s3, %s118_s5  }
  0x22   : > { %p611_p2 = pnand %p313_p0, %p151_p1  ;;  %s142_s27 = scalar_lea.hbm %s683_s1, %s502_s12 }
  0x23   : > { %s144_s28 = sshll.u32 %s142_s27, 4  ;;  %s139_s30 = scalar_lea.vmem [#allocation5], %s578_s23  ;;  %s145_s28 = int_to_ptr.hbm [resolvable:$true] %s144_s28 }
  0x24   : > { %s146_s6 = sshll.u32 %s139_s30, 4  ;;  %s137_s7 = scalar_lea.sflag [#allocation6], %s578_s23  ;;  %s147_s6 = int_to_ptr.vmem [resolvable:$true] %s146_s6 }
  0x25   : > { %s402_s8 = sshra.s32 %s145_s28, 4  ;;  %s409_s5 = scalar_lea.hbm %s683_s1, 16  ;;  %s403_s8 = int_to_ptr.hbm [resolvable:$true] %s402_s8 }
  0x26   : > { %s404_s14 = scalar_lea.hbm %s403_s8, 1  ;;  %p410_p4 = scmp.lt.s32.totalorder %s403_s8, %s683_s1 }
  0x27   : > { %p405_p9 = scmp.ne.s32.totalorder %s403_s8, %s404_s14  ;;  %p411_p7 = scmp.lt.s32.totalorder %s409_s5, %s404_s14 }
  0x29   : > { %p407_p0 = pnand %p405_p9, %p376_p3  ;;  %p412_p5 = por %p411_p7, %p410_p4 }
  0x2b   : > { %p408_p1 = pneg %p407_p0 }
  0x2d   : > { %p413_p8 = pnand %p412_p5, %p408_p1 }
  0x2f   : > { %416 = shalt.err (!%p413_p8)
}
  0x30   : > { %332 = dma.hbm_to_vmem [thread:$0]  (!%p587_p13), %s145_s28, 16, %s147_s6, %s137_s7  }
  0x31   : > { %155 = sbr.rel (%p611_p2) target bundleno = 72 (0x48), region = 28  ;;  %s635_s23 = sand.u32 (!%p611_p2), 1, %s494_s10  }
  0x32   : > { %s314_s19 = sshll.u32 (!%p611_p2), %s635_s23, 1  ;;  %s158_s25 = scalar_lea.sflag (!%p611_p2), [#allocation3], %s635_s23 }
  0x33   : > { %s161_s26 = scalar_lea.vmem (!%p611_p2), [#allocation2], %s314_s19 }
  0x36   : > { %477 = dma.done.wait (%p562_p6), %s158_s25, 32  }
  0x37   : > { %479 = vsyncadd (%p562_p6), %s158_s25, 4294967264  ;;  %s168_s4 = scalar_lea.sflag [#allocation6], %s635_s23  ;;  %s170_s24 = scalar_lea.vmem [#allocation5], %s635_s23 }
  0x38   : > { %481 = dma.done.wait (%p562_p6), %s168_s4, 16  }
  0x39   : > { %483 = vsyncadd (%p562_p6), %s168_s4, 4294967280  ;;  %s317_s27 = sshll.u32 %s540_s13, 1  ;;  %s195_s7 = scalar_lea.vmem [#allocation7], %s314_s19  ;;  %v196_v0 = vld [vmem:[%s161_s26] sm:$0x3] }
  0x3a   : > { %s214_s6 = scalar_lea.hbm %s684_s2, %s317_s27  ;;  %s216_s8 = sshll.u32 %s195_s7, 4  ;;  %v371_v1 = vld [vmem:[%s170_s24] ss:$0 sm:$0xff]  ;;  %s217_s8 = int_to_ptr.vmem [resolvable:$true] %s216_s8 }
  0x3b   : > { %s218_s14 = sshll.u32 %s214_s6, 4  ;;  %v201_v2 = vadd.f32 %v371_v1, %v196_v0  ;;  %s204_s29 = scalar_lea.sflag [#allocation4], %s635_s23  ;;  %s219_s14 = int_to_ptr.hbm [resolvable:$true] %s218_s14 }
  0x3c   : > { %s446_s20 = sshra.s32 %s219_s14, 4  ;;  %s452_s16 = scalar_lea.hbm %s684_s2, 4  ;;  %s447_s20 = int_to_ptr.hbm [resolvable:$true] %s446_s20 }
  0x3d   : > { %202 = vst [vmem:[%s195_s7] sm:$0x3] %v201_v2  ;;  %s448_s3 = scalar_lea.hbm %s447_s20, 2  ;;  %p453_p10 = scmp.lt.s32.totalorder %s447_s20, %s684_s2 }
  0x3e   : > { %p449_p6 = scmp.ne.s32.totalorder %s447_s20, %s448_s3  ;;  %p454_p2 = scmp.lt.s32.totalorder %s452_s16, %s448_s3 }
  0x40   : > { %p450_p13 = pnand %p449_p6, %p569_p11  ;;  %p455_p9 = por %p454_p2, %p453_p10 }
  0x42   : > { %p451_p3 = pneg %p450_p13 }
  0x44   : > { %p456_p0 = pnand %p455_p9, %p451_p3 }
  0x46   : > { %459 = shalt.err (!%p456_p0)
}
  0x47   : > { %324 = dma.vmem_to_hbm [thread:$0]  (%p569_p11), %s217_s8, 32, %s219_s14, %s204_s29  }
  0x48 PF: > { %s230_s23 = sand.u32 1, %s490_s9   ;;  %p691_p1 = scmp.ge.s32.totalorder %s502_s12, 2 }
  0x49   : > { %s231_s25 = scalar_lea.sflag [#allocation4], %s230_s23 }
  0x4a   : > { %p334_p4 = pnand %p691_p1, %p573_p12 }
  0x4c   : > { %p335_p7 = pneg %p334_p4 }
  0x4e   : > { %485 = dma.done.wait (%p335_p7), %s231_s25, 32  }
  0x4f   : > { %487 = vsyncadd (%p335_p7), %s231_s25, 4294967264  ;;  %p18_p5 = scmp.ge.s32.totalorder %s544_s15, 4   ;;  %s692_s9 = smov %s494_s10 }
  0x50   : > { %s693_s10 = smov %s498_s11  ;;  %s694_s11 = smov %s556_s18 }
  0x51   : > { %s695_s12 = smov %s544_s15  ;;  %20 = sbr.rel (!%p18_p5) target bundleno = 7 (0x7), region = 86 }
  0x56   :  { %237 = vsyncpa [#allocation3], 1 }
  0x57   :  { %239 = vsyncpa [#allocation3 + $0x1], 1 }
  0x58   :  { %240 = vsyncpa [#allocation6], 1 }
  0x59   :  { %242 = vsyncpa [#allocation6 + $0x1], 1 }
  0x5a   :  { %243 = vsyncpa [#allocation4], 1 }
  0x5b   :  { %245 = vsyncpa [#allocation4 + $0x1], 1 }

</bundles_post_ra>
